<compile_context>
chip_gen: v7x
topology: tpu7x:2x2x1
jax: 0.10.0
libtpu: 0.0.40
codegen_flags: <defaults>
</compile_context>

<pallas_src>
import jax
import jax.numpy as jnp
from jax.experimental import pallas as pl
from jax.experimental.pallas import tpu as pltpu

NEG_SLOPE = 0.01   # torch.nn.LeakyReLU default
BN_EPS = 1e-5      # torch.nn.BatchNorm1d default
LANE = 128
SUBLANE = 8
H1 = 128
H2 = 256


def _round_up(n, m):
    return ((n + m - 1) // m) * m


def _leaky_relu(h):
    return jnp.where(h > 0, h, NEG_SLOPE * h)


def fpl_linear_kernel(x_ref, w1_ref, b1_ref, w2_ref, b2_ref, w3_ref, b3_ref,
                      o_ref):
    """One batch tile through the fused 3-layer MLP.

    BN (eval mode) is pre-folded into the weights/biases, so each layer is
    MXU matmul (bf16 in, f32 acc) + f32 bias add (+ LeakyReLU for layers 1/2).
    """
    x = x_ref[...]                                   # bf16 (TB, in_pad)

    # Layer 1: Linear(in_dim,128) with BN(128) folded in + LeakyReLU
    h = jnp.dot(x, w1_ref[...], preferred_element_type=jnp.float32)
    h = _leaky_relu(h + b1_ref[0:1, :])

    # Layer 2: Linear(128,256) with BN(256) folded in + LeakyReLU
    h = jnp.dot(h.astype(jnp.bfloat16), w2_ref[...],
                preferred_element_type=jnp.float32)
    h = _leaky_relu(h + b2_ref[0:1, :])

    # Layer 3: Linear(256,out_dim) + bias
    o = jnp.dot(h.astype(jnp.bfloat16), w3_ref[...],
                preferred_element_type=jnp.float32)
    o_ref[...] = (o + b3_ref[0:1, :]).astype(o_ref.dtype)


def fpl_linear_forward(x, params, *, block_b=512):
    """x: [B, in_dim] float32. Returns [B, out_dim] float32."""
    B, in_dim = x.shape
    w1, b1 = params["w1"], params["b1"]
    w2, b2 = params["w2"], params["b2"]
    w3, b3 = params["w3"], params["b3"]
    out_dim = params["out_dim"]
    in_pad = w1.shape[0]
    out_pad = w3.shape[1]

    # Batch tile: multiple of 8 sublanes, capped at block_b; pad B to a multiple.
    tb = min(block_b, _round_up(B, SUBLANE))
    b_pad = _round_up(B, tb)
    grid = (b_pad // tb,)

    # bf16 stream; zero-pad features to lane-dense width and batch to tile size.
    x_p = jnp.pad(x.astype(jnp.bfloat16),
                  ((0, b_pad - B), (0, in_pad - in_dim)))

    def stream_spec(rows, cols):
        return pl.BlockSpec((rows, cols), lambda i: (i, 0))

    def resident_spec(shape):
        return pl.BlockSpec(shape, lambda i: (0, 0))

    flops = 2 * b_pad * (in_pad * H1 + H1 * H2 + H2 * out_pad)
    bytes_accessed = (x_p.size * x_p.dtype.itemsize
                      + b_pad * out_pad * 4
                      + sum(a.size * a.dtype.itemsize
                            for a in (w1, b1, w2, b2, w3, b3)))

    out = pl.pallas_call(
        fpl_linear_kernel,
        out_shape=jax.ShapeDtypeStruct((b_pad, out_pad), jnp.float32),
        grid_spec=pltpu.PrefetchScalarGridSpec(
            num_scalar_prefetch=0,
            grid=grid,
            in_specs=[
                stream_spec(tb, in_pad),             # x: streamed per tile
                resident_spec(w1.shape), resident_spec(b1.shape),
                resident_spec(w2.shape), resident_spec(b2.shape),
                resident_spec(w3.shape), resident_spec(b3.shape),
            ],
            out_specs=stream_spec(tb, out_pad),      # out: streamed per tile
        ),
        compiler_params=pltpu.CompilerParams(
            dimension_semantics=("parallel",)),
        cost_estimate=pl.CostEstimate(
            flops=flops, transcendentals=0, bytes_accessed=bytes_accessed),
    )(x_p, w1, b1, w2, b2, w3, b3)

    return out[:B, :out_dim]


def init_params(key, in_dim, out_dim):
    """PyTorch-style Linear/BatchNorm1d init; eval-mode BN folded column-wise
    into the weights and biases.  Weights stored pre-transposed [in, out],
    bf16, zero-padded to lane-dense multiples of 128.  Biases stored as
    8-sublane-aligned f32 rows."""
    in_pad = _round_up(in_dim, LANE)
    out_pad = _round_up(out_dim, LANE)
    keys = jax.random.split(key, 16)
    ki = iter(range(16))

    def lin_init(k_w, k_b, fan_in, fan_out):
        bound = 1.0 / jnp.sqrt(fan_in)
        w = jax.random.uniform(k_w, (fan_in, fan_out), jnp.float32, -bound, bound)
        b = jax.random.uniform(k_b, (fan_out,), jnp.float32, -bound, bound)
        return w, b

    def bn_fold(k_g, k_be, k_rm, k_rv, w, b, f):
        """Fold eval-mode BN into (w, b): y = (x@w + b - rm)/sqrt(rv+eps)*g + be."""
        gamma = 1.0 + 0.1 * jax.random.normal(k_g, (f,), jnp.float32)
        beta = 0.1 * jax.random.normal(k_be, (f,), jnp.float32)
        rmean = 0.1 * jax.random.normal(k_rm, (f,), jnp.float32)
        rvar = 1.0 + 0.1 * jax.random.uniform(k_rv, (f,), jnp.float32)
        scale = gamma / jnp.sqrt(rvar + BN_EPS)
        w_f = w * scale[None, :]
        b_f = (b - rmean) * scale + beta
        return w_f, b_f

    def bias_row(b, width):
        row = jnp.zeros((SUBLANE, width), jnp.float32)
        return row.at[0, :b.shape[0]].set(b)

    # Linear(in_dim,128) + BN(128) folded
    w1, b1 = lin_init(keys[next(ki)], keys[next(ki)], in_dim, H1)
    w1, b1 = bn_fold(keys[next(ki)], keys[next(ki)], keys[next(ki)],
                     keys[next(ki)], w1, b1, H1)
    w1 = jnp.pad(w1, ((0, in_pad - in_dim), (0, 0))).astype(jnp.bfloat16)
    b1 = bias_row(b1, H1)

    # Linear(128,256) + BN(256) folded
    w2, b2 = lin_init(keys[next(ki)], keys[next(ki)], H1, H2)
    w2, b2 = bn_fold(keys[next(ki)], keys[next(ki)], keys[next(ki)],
                     keys[next(ki)], w2, b2, H2)
    w2 = w2.astype(jnp.bfloat16)
    b2 = bias_row(b2, H2)

    # Linear(256,out_dim)
    w3, b3 = lin_init(keys[next(ki)], keys[next(ki)], H2, out_dim)
    w3 = jnp.pad(w3, ((0, 0), (0, out_pad - out_dim))).astype(jnp.bfloat16)
    b3 = bias_row(b3, out_pad)

    return {"w1": w1, "b1": b1, "w2": w2, "b2": b2, "w3": w3, "b3": b3,
            "in_dim": in_dim, "out_dim": out_dim}


def reference_forward(x, params):
    """Plain-JAX reference with identical bf16-matmul / f32-elementwise math."""
    in_dim, out_dim = params["in_dim"], params["out_dim"]
    h = jnp.dot(x.astype(jnp.bfloat16), params["w1"][:in_dim, :],
                preferred_element_type=jnp.float32)
    h = _leaky_relu(h + params["b1"][0])
    h = jnp.dot(h.astype(jnp.bfloat16), params["w2"],
                preferred_element_type=jnp.float32)
    h = _leaky_relu(h + params["b2"][0])
    o = jnp.dot(h.astype(jnp.bfloat16), params["w3"],
                preferred_element_type=jnp.float32)
    o = o + params["b3"][0]
    return o[:, :out_dim]


if __name__ == "__main__":
    B, IN_DIM, OUT_DIM = 8, 32, 8
    key = jax.random.PRNGKey(0)
    k_x, k_p = jax.random.split(key)

    x = jax.random.normal(k_x, (B, IN_DIM), jnp.float32)
    params = init_params(k_p, IN_DIM, OUT_DIM)

    out = jax.block_until_ready(fpl_linear_forward(x, params))

    ref = reference_forward(x, params)
    assert out.shape == (B, OUT_DIM)
    assert jnp.allclose(out, ref, atol=1e-2, rtol=1e-2), "mismatch vs reference"

    print("KERNEL_OK")
</pallas_src>

<mosaic_0001>
module attributes {stable_mosaic.version = 11 : i64} {
  func.func @fpl_linear_kernel(%arg0: i32, %arg1: memref<8x128xbf16, #tpu.memory_space<vmem>>, %arg2: memref<128x128xbf16, #tpu.memory_space<vmem>>, %arg3: memref<8x128xf32, #tpu.memory_space<vmem>>, %arg4: memref<128x256xbf16, #tpu.memory_space<vmem>>, %arg5: memref<8x256xf32, #tpu.memory_space<vmem>>, %arg6: memref<256x128xbf16, #tpu.memory_space<vmem>>, %arg7: memref<8x128xf32, #tpu.memory_space<vmem>>, %arg8: memref<8x128xf32, #tpu.memory_space<vmem>>) attributes {dimension_semantics = [#tpu.dimension_semantics<parallel>], iteration_bounds = array<i64: 1>, scalar_prefetch = 0 : i64, scratch_operands = 0 : i64, tpu.core_type = #tpu.core_type<tc>, window_params = [{transform_indices = @transform_0, window_bounds = array<i64: 8, 128>}, {pipeline_mode = #tpu.pipeline_mode<synchronous>, transform_indices = @transform_1, window_bounds = array<i64: 128, 128>}, {pipeline_mode = #tpu.pipeline_mode<synchronous>, transform_indices = @transform_2, window_bounds = array<i64: 8, 128>}, {pipeline_mode = #tpu.pipeline_mode<synchronous>, transform_indices = @transform_3, window_bounds = array<i64: 128, 256>}, {pipeline_mode = #tpu.pipeline_mode<synchronous>, transform_indices = @transform_4, window_bounds = array<i64: 8, 256>}, {pipeline_mode = #tpu.pipeline_mode<synchronous>, transform_indices = @transform_5, window_bounds = array<i64: 256, 128>}, {pipeline_mode = #tpu.pipeline_mode<synchronous>, transform_indices = @transform_6, window_bounds = array<i64: 8, 128>}, {transform_indices = @transform_7, window_bounds = array<i64: 8, 128>}]} {
    %c0 = arith.constant 0 : index
    %c0_0 = arith.constant 0 : index
    %0 = vector.load %arg1[%c0, %c0_0] : memref<8x128xbf16, #tpu.memory_space<vmem>>, vector<8x128xbf16>
    %c0_1 = arith.constant 0 : index
    %c0_2 = arith.constant 0 : index
    %1 = vector.load %arg2[%c0_1, %c0_2] : memref<128x128xbf16, #tpu.memory_space<vmem>>, vector<128x128xbf16>
    %cst = arith.constant dense<0.000000e+00> : vector<8x128xf32>
    %2 = tpu.matmul %0, %1, %cst {dimension_numbers = #tpu.dot_dimension_numbers<[1], [0], [0], [1], [0, 0, 1, 1], [], []>} : vector<8x128xbf16>, vector<128x128xbf16>, vector<8x128xf32> -> vector<8x128xf32>
    %c0_3 = arith.constant 0 : index
    %c0_4 = arith.constant 0 : index
    %3 = vector.load %arg3[%c0_3, %c0_4] : memref<8x128xf32, #tpu.memory_space<vmem>>, vector<1x128xf32>
    %4 = vector.broadcast %3 : vector<1x128xf32> to vector<8x128xf32>
    %5 = arith.addf %2, %4 : vector<8x128xf32>
    %cst_5 = arith.constant 0.000000e+00 : f32
    %6 = vector.broadcast %cst_5 : f32 to vector<8x128xf32>
    %7 = arith.cmpf ogt, %5, %6 : vector<8x128xf32>
    %cst_6 = arith.constant 0.00999999977 : f32
    %8 = vector.broadcast %cst_6 : f32 to vector<8x128xf32>
    %9 = arith.mulf %8, %5 : vector<8x128xf32>
    %10 = arith.select %7, %5, %9 : vector<8x128xi1>, vector<8x128xf32>
    %11 = arith.truncf %10 : vector<8x128xf32> to vector<8x128xbf16>
    %c0_7 = arith.constant 0 : index
    %c0_8 = arith.constant 0 : index
    %12 = vector.load %arg4[%c0_7, %c0_8] : memref<128x256xbf16, #tpu.memory_space<vmem>>, vector<128x256xbf16>
    %cst_9 = arith.constant dense<0.000000e+00> : vector<8x256xf32>
    %13 = tpu.matmul %11, %12, %cst_9 {dimension_numbers = #tpu.dot_dimension_numbers<[1], [0], [0], [1], [0, 0, 1, 1], [], []>} : vector<8x128xbf16>, vector<128x256xbf16>, vector<8x256xf32> -> vector<8x256xf32>
    %c0_10 = arith.constant 0 : index
    %c0_11 = arith.constant 0 : index
    %14 = vector.load %arg5[%c0_10, %c0_11] : memref<8x256xf32, #tpu.memory_space<vmem>>, vector<1x256xf32>
    %15 = vector.broadcast %14 : vector<1x256xf32> to vector<8x256xf32>
    %16 = arith.addf %13, %15 : vector<8x256xf32>
    %cst_12 = arith.constant 0.000000e+00 : f32
    %17 = vector.broadcast %cst_12 : f32 to vector<8x256xf32>
    %18 = arith.cmpf ogt, %16, %17 : vector<8x256xf32>
    %cst_13 = arith.constant 0.00999999977 : f32
    %19 = vector.broadcast %cst_13 : f32 to vector<8x256xf32>
    %20 = arith.mulf %19, %16 : vector<8x256xf32>
    %21 = arith.select %18, %16, %20 : vector<8x256xi1>, vector<8x256xf32>
    %22 = arith.truncf %21 : vector<8x256xf32> to vector<8x256xbf16>
    %c0_14 = arith.constant 0 : index
    %c0_15 = arith.constant 0 : index
    %23 = vector.load %arg6[%c0_14, %c0_15] : memref<256x128xbf16, #tpu.memory_space<vmem>>, vector<256x128xbf16>
    %cst_16 = arith.constant dense<0.000000e+00> : vector<8x128xf32>
    %24 = tpu.matmul %22, %23, %cst_16 {dimension_numbers = #tpu.dot_dimension_numbers<[1], [0], [0], [1], [0, 0, 1, 1], [], []>} : vector<8x256xbf16>, vector<256x128xbf16>, vector<8x128xf32> -> vector<8x128xf32>
    %c0_17 = arith.constant 0 : index
    %c0_18 = arith.constant 0 : index
    %25 = vector.load %arg7[%c0_17, %c0_18] : memref<8x128xf32, #tpu.memory_space<vmem>>, vector<1x128xf32>
    %26 = vector.broadcast %25 : vector<1x128xf32> to vector<8x128xf32>
    %27 = arith.addf %24, %26 : vector<8x128xf32>
    %c0_19 = arith.constant 0 : index
    %c0_20 = arith.constant 0 : index
    %28 = vector.load %arg8[%c0_19, %c0_20] : memref<8x128xf32, #tpu.memory_space<vmem>>, vector<8x128xf32>
    tpu.vector_store %arg8[%c0_19, %c0_20], %27 {strides = array<i32>} : memref<8x128xf32, #tpu.memory_space<vmem>>, vector<8x128xf32>,
    return
  }
  func.func @transform_0(%arg0: i32) -> (i32, i32) {
    %c0_i32 = arith.constant 0 : i32
    %c0_i32_0 = arith.constant 0 : i32
    return %arg0, %c0_i32 : i32, i32
  }
  func.func @transform_1(%arg0: i32) -> (i32, i32) {
    %c0_i32 = arith.constant 0 : i32
    %c0_i32_0 = arith.constant 0 : i32
    %c0_i32_1 = arith.constant 0 : i32
    return %c0_i32, %c0_i32_0 : i32, i32
  }
  func.func @transform_2(%arg0: i32) -> (i32, i32) {
    %c0_i32 = arith.constant 0 : i32
    %c0_i32_0 = arith.constant 0 : i32
    %c0_i32_1 = arith.constant 0 : i32
    return %c0_i32, %c0_i32_0 : i32, i32
  }
  func.func @transform_3(%arg0: i32) -> (i32, i32) {
    %c0_i32 = arith.constant 0 : i32
    %c0_i32_0 = arith.constant 0 : i32
    %c0_i32_1 = arith.constant 0 : i32
    return %c0_i32, %c0_i32_0 : i32, i32
  }
  func.func @transform_4(%arg0: i32) -> (i32, i32) {
    %c0_i32 = arith.constant 0 : i32
    %c0_i32_0 = arith.constant 0 : i32
    %c0_i32_1 = arith.constant 0 : i32
    return %c0_i32, %c0_i32_0 : i32, i32
  }
  func.func @transform_5(%arg0: i32) -> (i32, i32) {
    %c0_i32 = arith.constant 0 : i32
    %c0_i32_0 = arith.constant 0 : i32
    %c0_i32_1 = arith.constant 0 : i32
    return %c0_i32, %c0_i32_0 : i32, i32
  }
  func.func @transform_6(%arg0: i32) -> (i32, i32) {
    %c0_i32 = arith.constant 0 : i32
    %c0_i32_0 = arith.constant 0 : i32
    %c0_i32_1 = arith.constant 0 : i32
    return %c0_i32, %c0_i32_0 : i32, i32
  }
  func.func @transform_7(%arg0: i32) -> (i32, i32) {
    %c0_i32 = arith.constant 0 : i32
    %c0_i32_0 = arith.constant 0 : i32
    return %arg0, %c0_i32 : i32, i32
  }
}

</mosaic_0001>

<bundles_post_ra>
// kernel: tpu_custom_call.1
= control target key start
LH: loop header
LB: loop body
LE: loop exit
PB: predicated region body
PF: predicated region fallthrough
CT: control target
= control target key end

     0   :  { %12 = vsyncpa [#allocation3], 0  ;;  %s1040_s0 = inlined_call_operand.hbm [shape: bf16[8,128], index: 0, kind: input, shape index: {}]   ;;  %s1041_s1 = inlined_call_operand.hbm [shape: bf16[128,128], index: 1, kind: input, shape index: {}]   ;;  %s1042_s2 = inlined_call_operand.hbm [shape: f32[8,128], index: 2, kind: input, shape index: {}]   ;;  %s1043_s3 = inlined_call_operand.hbm [shape: bf16[128,256], index: 3, kind: input, shape index: {}]   ;;  %s1044_s4 = inlined_call_operand.hbm [shape: f32[8,256], index: 4, kind: input, shape index: {}]   ;;  %s1045_s5 = inlined_call_operand.hbm [shape: bf16[256,128], index: 5, kind: input, shape index: {}]   ;;  %s1046_s6 = inlined_call_operand.vmem [shape: f32[8,128], index: 6, kind: input, shape index: {}]   ;;  %s1047_s7 = inlined_call_operand.hbm [shape: f32[8,128], index: 7, kind: output, shape index: {}]  }
   0x1   :  { %13 = vsyncpa [#allocation6], 0 }
   0x2   :  { %14 = vsyncpa [#allocation9], 0 }
   0x3   :  { %15 = vsyncpa [#allocation12], 0 }
   0x4   :  { %16 = vsyncpa [#allocation4], 0  ;;  %s886_s24 = smov [#allocation5]   ;;  %s722_s28 = scalar_lea.hbm %s1041_s1, 1024 }
   0x5   :  { %s32_s25 = sshll.u32 %s886_s24, 4  ;;  %p723_p0 = scmp.ne.s32.totalorder %s1041_s1, %s722_s28  ;;  %s33_s25 = int_to_ptr.vmem [resolvable:$true] %s32_s25 }
   0x6   :  { %p726_p1 = scmp.lt.u32.totalorder %s722_s28, %s1041_s1 }
   0x8   :  { %p728_p2 = pnand %p726_p1, %p723_p0 }
   0xa   :  { %731 = shalt.err (!%p728_p2)
}
   0xb   :  { %s732_s10 = scalar_lea.vmem %s33_s25, 1024  ;;  %p737_p4 = scmp.lt.s32.totalorder %s33_s25, %s33_s25 }
   0xc   :  { %p733_p3 = scmp.ne.s32.totalorder %s33_s25, %s732_s10  ;;  %p738_p5 = scmp.lt.s32.totalorder %s732_s10, %s732_s10 }
   0xe   :  { %p739_p6 = por %p738_p5, %p737_p4 }
  0x10   :  { %p740_p7 = pnand %p739_p6, %p733_p3 }
  0x12   :  { %743 = shalt.err (!%p740_p7)
}
  0x13   :  { %s887_s11 = smov 64   ;;  %s888_s12 = smov 4  }
  0x14   :  { %38 = dma.hbm_to_vmem [thread:$0]  %s1041_s1, 1024, %s33_s25, [#allocation6], %s887_s11, %s887_s11, %s888_s12  }
  0x15   :  { %s889_s15 = smov [#allocation8]   ;;  %s744_s19 = scalar_lea.hbm %s1043_s3, 2048 }
  0x16   :  { %s54_s16 = sshll.u32 %s889_s15, 4  ;;  %p745_p8 = scmp.ne.s32.totalorder %s1043_s3, %s744_s19  ;;  %s55_s16 = int_to_ptr.vmem [resolvable:$true] %s54_s16 }
  0x17   :  { %p748_p9 = scmp.lt.u32.totalorder %s744_s19, %s1043_s3 }
  0x19   :  { %p750_p10 = pnand %p748_p9, %p745_p8 }
  0x1b   :  { %753 = shalt.err (!%p750_p10)
}
  0x1c   :  { %s754_s24 = scalar_lea.vmem %s55_s16, 2048  ;;  %p759_p12 = scmp.lt.s32.totalorder %s55_s16, %s55_s16 }
  0x1d   :  { %p755_p11 = scmp.ne.s32.totalorder %s55_s16, %s754_s24  ;;  %p760_p13 = scmp.lt.s32.totalorder %s754_s24, %s754_s24 }
  0x1f   :  { %p761_p0 = por %p760_p13, %p759_p12 }
  0x21   :  { %p762_p1 = pnand %p761_p0, %p755_p11 }
  0x23   :  { %765 = shalt.err (!%p762_p1)
}
  0x24   :  { %s890_s1 = smov 128   ;;  %s891_s25 = smov 8  }
  0x25   :  { %60 = dma.hbm_to_vmem [thread:$0]  %s1043_s3, 2048, %s55_s16, [#allocation9], %s890_s1, %s890_s1, %s891_s25  }
  0x26   :  { %s892_s28 = smov [#allocation2]   ;;  %s893_s30 = smov [#allocation7]  }
  0x27   :  { %s23_s29 = sshll.u32 %s892_s28, 4  ;;  %s45_s8 = sshll.u32 %s893_s30, 4  ;;  %s24_s29 = int_to_ptr.vmem [resolvable:$true] %s23_s29  ;;  %s46_s8 = int_to_ptr.vmem [resolvable:$true] %s45_s8 }
  0x28   :  { %s766_s13 = scalar_lea.hbm %s1040_s0, 64 }
  0x29   :  { %p767_p2 = scmp.ne.s32.totalorder %s1040_s0, %s766_s13  ;;  %p770_p3 = scmp.lt.u32.totalorder %s766_s13, %s1040_s0 }
  0x2b   :  { %p772_p4 = pnand %p770_p3, %p767_p2 }
  0x2d   :  { %775 = shalt.err (!%p772_p4)
}
  0x2e   :  { %s776_s3 = scalar_lea.vmem %s24_s29, 64  ;;  %p781_p6 = scmp.lt.s32.totalorder %s24_s29, %s24_s29 }
  0x2f   :  { %p777_p5 = scmp.ne.s32.totalorder %s24_s29, %s776_s3  ;;  %p782_p7 = scmp.lt.s32.totalorder %s776_s3, %s776_s3 }
  0x31   :  { %p783_p8 = por %p782_p7, %p781_p6 }
  0x33   :  { %p784_p9 = pnand %p783_p8, %p777_p5 }
  0x35   :  { %787 = shalt.err (!%p784_p9)
}
  0x36   :  { %26 = dma.hbm_to_vmem [thread:$0]  %s1040_s0, 64, %s24_s29, [#allocation3]  }
  0x37   :  { %s788_s22 = scalar_lea.hbm %s1042_s2, 128 }
  0x38   :  { %p789_p10 = scmp.ne.s32.totalorder %s1042_s2, %s788_s22  ;;  %p792_p11 = scmp.lt.u32.totalorder %s788_s22, %s1042_s2 }
  0x3a   :  { %p794_p12 = pnand %p792_p11, %p789_p10 }
  0x3c   :  { %797 = shalt.err (!%p794_p12)
}
  0x3d   :  { %s798_s26 = scalar_lea.vmem %s46_s8, 128  ;;  %p803_p0 = scmp.lt.s32.totalorder %s46_s8, %s46_s8 }
  0x3e   :  { %p799_p13 = scmp.ne.s32.totalorder %s46_s8, %s798_s26  ;;  %p804_p1 = scmp.lt.s32.totalorder %s798_s26, %s798_s26 }
  0x40   :  { %p805_p2 = por %p804_p1, %p803_p0 }
  0x42   :  { %p806_p3 = pnand %p805_p2, %p799_p13 }
  0x44   :  { %809 = shalt.err (!%p806_p3)
}
  0x45   :  { %48 = dma.hbm_to_vmem [thread:$0]  %s1042_s2, 128, %s46_s8, [#allocation6]  }
  0x46   :  { %s894_s28 = smov [#allocation10]   ;;  %s895_s30 = smov [#allocation11]  }
  0x47   :  { %s67_s29 = sshll.u32 %s894_s28, 4  ;;  %s76_s9 = sshll.u32 %s895_s30, 4  ;;  %s68_s29 = int_to_ptr.vmem [resolvable:$true] %s67_s29  ;;  %s991_s9 = int_to_ptr.vmem [resolvable:$true] %s76_s9 }
  0x48   :  { %s810_s14 = scalar_lea.hbm %s1044_s4, 256 }
  0x49   :  { %p811_p4 = scmp.ne.s32.totalorder %s1044_s4, %s810_s14  ;;  %p814_p5 = scmp.lt.u32.totalorder %s810_s14, %s1044_s4 }
  0x4b   :  { %p816_p6 = pnand %p814_p5, %p811_p4 }
  0x4d   :  { %819 = shalt.err (!%p816_p6)
}
  0x4e   :  { %s820_s2 = scalar_lea.vmem %s68_s29, 256  ;;  %p825_p8 = scmp.lt.s32.totalorder %s68_s29, %s68_s29 }
  0x4f   :  { %p821_p7 = scmp.ne.s32.totalorder %s68_s29, %s820_s2  ;;  %p826_p9 = scmp.lt.s32.totalorder %s820_s2, %s820_s2 }
  0x51   :  { %p827_p10 = por %p826_p9, %p825_p8 }
  0x53   :  { %p828_p11 = pnand %p827_p10, %p821_p7 }
  0x55   :  { %831 = shalt.err (!%p828_p11)
}
  0x56   :  { %70 = dma.hbm_to_vmem [thread:$0]  %s1044_s4, 256, %s68_s29, [#allocation9]  }
  0x57   :  { %s832_s21 = scalar_lea.hbm %s1045_s5, 2048 }
  0x58   :  { %p833_p12 = scmp.ne.s32.totalorder %s1045_s5, %s832_s21  ;;  %p836_p13 = scmp.lt.u32.totalorder %s832_s21, %s1045_s5 }
  0x5a   :  { %p838_p0 = pnand %p836_p13, %p833_p12 }
  0x5c   :  { %841 = shalt.err (!%p838_p0)
}
  0x5d   :  { %s842_s25 = scalar_lea.vmem %s991_s9, 2048  ;;  %p847_p2 = scmp.lt.s32.totalorder %s991_s9, %s991_s9 }
  0x5e   :  { %p843_p1 = scmp.ne.s32.totalorder %s991_s9, %s842_s25  ;;  %p848_p3 = scmp.lt.s32.totalorder %s842_s25, %s842_s25 }
  0x60   :  { %p849_p4 = por %p848_p3, %p847_p2 }
  0x62   :  { %p850_p5 = pnand %p849_p4, %p843_p1 }
  0x64   :  { %853 = shalt.err (!%p850_p5)
}
  0x65   :  { %82 = dma.hbm_to_vmem [thread:$0]  %s1045_s5, 2048, %s991_s9, [#allocation12], %s887_s11, %s887_s11, %s888_s12  }
  0x66   :  { %876 = dma.done.wait [#allocation3], 64  }
  0x67   :  { %877 = vsyncadd [#allocation3], 4294967232 }
  0x68   :  { %878 = dma.done.wait [#allocation6], 1152  }
  0x69   :  { %879 = vsyncadd [#allocation6], 4294966144 }
  0x6a   :  { %880 = dma.done.wait [#allocation9], 2304  }
  0x6b   :  { %881 = vsyncadd [#allocation9], 4294964992 }
  0x6c   :  { %882 = dma.done.wait [#allocation12], 2048  }
  0x6d   :  { %883 = vsyncadd [#allocation12], 4294965248  ;;  %v896_v0 = vmov 0.0   ;;  %vm897_vm0 = vmmov 0   ;;  %v674_v1 = vld [vmem:[#allocation5] sm:$0xff]   ;;  %v675_v2 = vld [vmem:[#allocation5 + $0x8] sm:$0xff]   ;;  %v236_v52 = vlaneseq }
  0x6e   :  { %640 = vmatprep.subr.bf16.mxu0 %v896_v0  ;;  %656 = vmatprep.mubr.msk.bf16.mxu0 %vm897_vm0, %v896_v0  ;;  %v676_v3 = vld [vmem:[#allocation5 + $0x10] sm:$0xff]   ;;  %v677_v6 = vld [vmem:[#allocation5 + $0x18] sm:$0xff]   ;;  %v678_v10 = vld [vmem:[#allocation5 + $0x20] sm:$0xff]   ;;  %v898_v26 = vmov 0   ;;  %s899_s12 = smov [#allocation13]  }
  0x6f   :  { %641 = vmatpush3.bf16.msra.mxu0 %v674_v1  ;;  %v682_v4 = vld [vmem:[#allocation8 + $0x4] ss:$8 sps:$4 sm:$0xff]   ;;  %v684_v5 = vld [vmem:[#allocation8] ss:$8 sps:$4 sm:$0xff]   ;;  %v685_v7 = vld [vmem:[#allocation8 + $0x14] ss:$8 sps:$4 sm:$0xff]   ;;  %358 = vmatprep.mubr.bf16.mxu1 %v898_v26 }
  0x70   :  { %642 = vmatprep.subr.bf16.mxu0 %v896_v0  ;;  %326 = vmatprep.subr.bf16.mxu1 %v682_v4  ;;  %v687_v8 = vld [vmem:[#allocation8 + $0x10] ss:$8 sps:$4 sm:$0xff]   ;;  %v688_v9 = vld [vmem:[#allocation8 + $0x24] ss:$8 sps:$4 sm:$0xff]   ;;  %v690_v12 = vld [vmem:[#allocation8 + $0x20] ss:$8 sps:$4 sm:$0xff]  }
  0x71   :  { %327 = vmatpush1.bf16.msra.mxu1 %v684_v5  ;;  %v679_v11 = vld [vmem:[#allocation5 + $0x28] sm:$0xff]   ;;  %v691_v13 = vld [vmem:[#allocation8 + $0x34] ss:$8 sps:$4 sm:$0xff]   ;;  %v693_v14 = vld [vmem:[#allocation8 + $0x30] ss:$8 sps:$4 sm:$0xff]   ;;  %v237_v53 = vshrl.u32 %v236_v52, 7 }
  0x72   :  { %328 = vmatprep.subr.bf16.mxu1 %v685_v7  ;;  %v694_v15 = vld [vmem:[#allocation8 + $0x44] ss:$8 sps:$4 sm:$0xff]   ;;  %v696_v17 = vld [vmem:[#allocation8 + $0x40] ss:$8 sps:$4 sm:$0xff]   ;;  %v697_v18 = vld [vmem:[#allocation8 + $0x54] ss:$8 sps:$4 sm:$0xff]  }
  0x73   :  { %643 = vmatpush3.bf16.msra.mxu0 %v675_v2  ;;  %v680_v16 = vld [vmem:[#allocation5 + $0x30] sm:$0xff]   ;;  %v681_v19 = vld [vmem:[#allocation5 + $0x38] sm:$0xff]   ;;  %v708_v29 = vld [vmem:[#allocation11 + $0x48] sm:$0xff]   ;;  %v238_v54 = vsub.s32 0, %v237_v53  ;;  %v242_v56 = vsub.s32 1, %v237_v53  ;;  %s555_s0 = sshll.u32 %s899_s12, 4  ;;  %s556_s0 = int_to_ptr.vmem [resolvable:$true] %s555_s0 }
  0x74   :  { %644 = vmatprep.subr.bf16.mxu0 %v896_v0  ;;  %v699_v20 = vld [vmem:[#allocation8 + $0x50] ss:$8 sps:$4 sm:$0xff]   ;;  %v104_v21 = vld [vmem:[#allocation2] sm:$0xf]  ;;  %v700_v22 = vld [vmem:[#allocation8 + $0x64] ss:$8 sps:$4 sm:$0xff]   ;;  %p859_p7 = scmp.lt.s32.totalorder %s556_s0, %s556_s0 }
  0x75   :  { %329 = vmatpush1.bf16.msra.mxu1 %v687_v8  ;;  %v702_v23 = vld [vmem:[#allocation8 + $0x60] ss:$8 sps:$4 sm:$0xff]   ;;  %v703_v24 = vld [vmem:[#allocation8 + $0x74] ss:$8 sps:$4 sm:$0xff]   ;;  %v705_v25 = vld [vmem:[#allocation8 + $0x70] ss:$8 sps:$4 sm:$0xff]  }
  0x76   :  { %330 = vmatprep.subr.bf16.mxu1 %v688_v9  ;;  %v706_v27 = vld [vmem:[#allocation11 + $0x40] sm:$0xff]   ;;  %v709_v30 = vld [vmem:[#allocation11 + $0x8] sm:$0xff]   ;;  %v710_v31 = vld [vmem:[#allocation11 + $0x50] sm:$0xff]   ;;  %s854_s27 = scalar_lea.vmem %s556_s0, 128 }
  0x77   :  { %645 = vmatpush3.bf16.msra.mxu0 %v676_v3  ;;  %v707_v28 = vld [vmem:[#allocation11] sm:$0xff]   ;;  %v711_v32 = vld [vmem:[#allocation11 + $0x10] sm:$0xff]   ;;  %v712_v33 = vld [vmem:[#allocation11 + $0x58] sm:$0xff]   ;;  %p855_p6 = scmp.ne.s32.totalorder %s556_s0, %s854_s27  ;;  %p860_p8 = scmp.lt.s32.totalorder %s854_s27, %s854_s27 }
  0x78   :  { %646 = vmatprep.subr.bf16.mxu0 %v896_v0  ;;  %v713_v34 = vld [vmem:[#allocation11 + $0x18] sm:$0xff]   ;;  %v714_v35 = vld [vmem:[#allocation11 + $0x60] sm:$0xff]   ;;  %v716_v37 = vld [vmem:[#allocation11 + $0x68] sm:$0xff]  }
  0x79   :  { %331 = vmatpush1.bf16.msra.mxu1 %v690_v12  ;;  %v715_v36 = vld [vmem:[#allocation11 + $0x20] sm:$0xff]   ;;  %v717_v38 = vld [vmem:[#allocation11 + $0x28] sm:$0xff]   ;;  %v718_v48 = vld [vmem:[#allocation11 + $0x70] sm:$0xff]   ;;  %p861_p9 = por %p860_p8, %p859_p7 }
  0x7a   :  { %332 = vmatprep.subr.bf16.mxu1 %v691_v13  ;;  %v567_v39 = vld [vmem:[#allocation7] ss:$0 sm:$0xff]  ;;  %v719_v49 = vld [vmem:[#allocation11 + $0x30] sm:$0xff]   ;;  %v720_v50 = vld [vmem:[#allocation11 + $0x78] sm:$0xff]  }
  0x7b   :  { %647 = vmatpush3.bf16.msra.mxu0 %v677_v6  ;;  %v721_v51 = vld [vmem:[#allocation11 + $0x38] sm:$0xff]   ;;  %p862_p10 = pnand %p861_p9, %p855_p6 }
  0x7c   :  { %648 = vmatprep.subr.bf16.mxu0 %v896_v0  ;;  %v234_v55 = vld [vmem:[#allocation10] ss:$8 sm:$0x3]  ;;  %v592_v8 = vld [vmem:[%s1046_s6] ss:$0 sm:$0xff] }
  0x7d   :  { %333 = vmatpush1.bf16.msra.mxu1 %v693_v14  ;;  %v239_v57 = vrot.slane %v234_v55, %v238_v54  ;;  %v243_v58 = vrot.slane %v234_v55, %v242_v56 }
  0x7e   :  { %334 = vmatprep.subr.bf16.mxu1 %v694_v15 }
  0x7f   :  { %649 = vmatpush3.bf16.msra.mxu0 %v678_v10 }
  0x80   :  { %650 = vmatprep.subr.bf16.mxu0 %v896_v0 }
  0x81   :  { %335 = vmatpush1.bf16.msra.mxu1 %v696_v17 }
  0x82   :  { %336 = vmatprep.subr.bf16.mxu1 %v697_v18 }
  0x83   :  { %651 = vmatpush3.bf16.msra.mxu0 %v679_v11 }
  0x84   :  { %652 = vmatprep.subr.bf16.mxu0 %v896_v0 }
  0x85   :  { %337 = vmatpush1.bf16.msra.mxu1 %v699_v20 }
  0x86   :  { %338 = vmatprep.subr.bf16.mxu1 %v700_v22 }
  0x87   :  { %653 = vmatpush3.bf16.msra.mxu0 %v680_v16 }
  0x88   :  { %654 = vmatprep.subr.bf16.mxu0 %v896_v0 }
  0x89   :  { %339 = vmatpush1.bf16.msra.mxu1 %v702_v23 }
  0x8a   :  { %340 = vmatprep.subr.bf16.mxu1 %v703_v24 }
  0x8b   :  { %655 = vmatpush3.bf16.msra.mxu0 %v681_v19 }
  0x8c   :  { %618 = vmatprep.subr.bf16.mxu0 %v706_v27 }
  0x8d   :  { %341 = vmatpush1.bf16.msra.mxu1 %v705_v25 }
  0x8e   :  { %657 = vmatmul.mubr.bf16.vlgmr.msra.gmra.mrb[0].mxu0 %v104_v21 }
  0x8f   :  { %619 = vmatpush3.bf16.msra.mxu0 %v707_v28 }
  0x90   :  { %620 = vmatprep.subr.bf16.mxu0 %v708_v29 }
  0x93   :  { %621 = vmatpush3.bf16.msra.mxu0 %v709_v30 }
  0x94   :  { %622 = vmatprep.subr.bf16.mxu0 %v710_v31 }
  0x97   :  { %623 = vmatpush3.bf16.msra.mxu0 %v711_v32 }
  0x98   :  { %624 = vmatprep.subr.bf16.mxu0 %v712_v33 }
  0x9b   :  { %625 = vmatpush3.bf16.msra.mxu0 %v713_v34 }
  0x9c   :  { %626 = vmatprep.subr.bf16.mxu0 %v714_v35 }
  0x9f   :  { %627 = vmatpush3.bf16.msra.mxu0 %v715_v36 }
  0xa0   :  { %628 = vmatprep.subr.bf16.mxu0 %v716_v37 }
  0xa3   :  { %629 = vmatpush3.bf16.msra.mxu0 %v717_v38 }
  0xa4   :  { %630 = vmatprep.subr.bf16.mxu0 %v718_v48 }
  0xa7   :  { %631 = vmatpush3.bf16.msra.mxu0 %v719_v49 }
  0xa8   :  { %632 = vmatprep.subr.bf16.mxu0 %v720_v50 }
  0xab   :  { %633 = vmatpush3.bf16.msra.mxu0 %v721_v51 }
 0x161   :  { %v208_v40 = vpop.f32.mrb[0].mxu0 }
 0x162   :  { %v209_v41 = vadd.f32 %v567_v39, %v208_v40  ;;  %v658_v42 = vpop.f32.mrb[1].mxu0 }
 0x163   :  { %v211_v43 = vpop.f32.mrb[2].mxu0 }
 0x164   :  { %vm214_vm1 = vcmp.gt.f32.partialorder %v209_v41, 0.0  ;;  %v215_v44 = vmul.f32 0.01, %v209_v41  ;;  %v659_v45 = vpop.f32.mrb[3].mxu0 }
 0x166   :  { %v216_v46 = vsel %vm214_vm1, %v209_v41, %v215_v44 }
 0x167   :  { %v217_v47 = vpack.c.bf16 %v216_v46, %v216_v46 }
 0x169   :  { %359 = vmatmul.mubr.bf16.vlgmr.msra.gmra.mrb[0].mxu1 %v217_v47 }
 0x23c   :  { %v360_v59 = vpop.f32.mrb[0].mxu1 }
 0x23d   :  { %v361_v60 = vadd.f32 %v360_v59, %v239_v57  ;;  %v362_v61 = vpop.f32.mrb[1].mxu1 }
 0x23e   :  { %v363_v62 = vadd.f32 %v362_v61, %v243_v58  ;;  %v364_v63 = vpop.f32.mrb[2].mxu1 }
 0x23f   :  { %vm367_vm2 = vcmp.gt.f32.partialorder %v361_v60, 0.0  ;;  %v369_v0 = vmul.f32 0.01, %v361_v60  ;;  %v365_v1 = vpop.f32.mrb[3].mxu1 }
 0x240   :  { %vm368_vm3 = vcmp.gt.f32.partialorder %v363_v62, 0.0  ;;  %v370_v2 = vmul.f32 0.01, %v363_v62 }
 0x241   :  { %v371_v3 = vsel %vm367_vm2, %v361_v60, %v369_v0 }
 0x242   :  { %v372_v4 = vsel %vm368_vm3, %v363_v62, %v370_v2  ;;  %v373_v6 = vpack.c.bf16 %v371_v3, %v371_v3 }
 0x243   :  { %v374_v5 = vpack.c.bf16 %v372_v4, %v372_v4 }
 0x245   :  { %540 = vmatprep.mubr.bf16.mxu0 %v374_v5 }
 0x246   :  { %541 = vmatmul.mubr.bf16.vlgmr.msra.gmra.mrb[4].mxu0 %v373_v6 }
 0x319   :  { %v634_v7 = vpop.f32.mrb[4].mxu0 }
 0x31a   :  { %v635_v9 = vpop.f32.mrb[5].mxu0 }
 0x31b   :  { %v636_v10 = vadd.f32 %v635_v9, %v634_v7  ;;  %v637_v11 = vpop.f32.mrb[6].mxu0 }
 0x31c   :  { %v638_v12 = vpop.f32.mrb[7].mxu0 }
 0x31d   :  { %v543_v13 = vadd.f32 %v636_v10, %v592_v8 }
 0x31f   :  { %548 = vst [vmem:[#allocation13] sm:$0xff] %v543_v13 }
 0x320   :  { %865 = shalt.err (!%p862_p10)
}
 0x321   :  { %s866_s6 = scalar_lea.hbm %s1047_s7, 128 }
 0x322   :  { %p867_p11 = scmp.ne.s32.totalorder %s1047_s7, %s866_s6  ;;  %p870_p12 = scmp.lt.u32.totalorder %s866_s6, %s1047_s7 }
 0x324   :  { %p872_p13 = pnand %p870_p12, %p867_p11 }
 0x326   :  { %875 = shalt.err (!%p872_p13)
}
 0x327   :  { %558 = dma.vmem_to_hbm [thread:$0]  %s556_s0, 128, %s1047_s7, [#allocation4]  }
 0x328   :  { %884 = dma.done.wait [#allocation4], 128  }
 0x329   :  { %885 = vsyncadd [#allocation4], 4294967168 }
 0x32a   :  { %562 = vsyncpa [#allocation3], 1 }
 0x32b   :  { %563 = vsyncpa [#allocation6], 1 }
 0x32c   :  { %564 = vsyncpa [#allocation9], 1 }
 0x32d   :  { %565 = vsyncpa [#allocation12], 1 }
 0x32e   :  { %566 = vsyncpa [#allocation4], 1 }

</bundles_post_ra>
